<compile_context>
chip_gen: v6e
topology: v6e:2x2x1
jax: 0.10.0
libtpu: 0.0.40
codegen_flags: <defaults>
</compile_context>

<pallas_src>
import functools

import jax
import jax.numpy as jnp
from jax.experimental import pallas as pl
from jax.experimental.pallas import tpu as pltpu

NUM_CLASSES = 10
OUT_LANES = 128   # lane-dense width used for the final matmul / softmax reduce


def _round_up(v, m):
    return ((v + m - 1) // m) * m


def mlp_kernel(x_ref, w1_ref, b1_ref, w2_ref, b2_ref, w3_ref, b3_ref, o_ref):
    # ---- Linear(784, 256) + ReLU : bf16 operands, f32 accumulation ----
    x = x_ref[...]
    if x.dtype != jnp.bfloat16:
        x = x.astype(jnp.bfloat16)
    h1 = jnp.dot(x, w1_ref[...], preferred_element_type=jnp.float32) + b1_ref[...]
    h1 = jnp.maximum(h1, 0.0)
    # ---- Linear(256, 64) + ReLU ----
    h2 = jnp.dot(h1.astype(jnp.bfloat16), w2_ref[...],
                 preferred_element_type=jnp.float32) + b2_ref[...]
    h2 = jnp.maximum(h2, 0.0)
    # ---- Linear(64, 10) computed at 128 lanes (pad bias = -1e30 => exp()==0) ----
    logits = jnp.dot(h2.astype(jnp.bfloat16), w3_ref[...],
                     preferred_element_type=jnp.float32) + b3_ref[...]
    # ---- Stable LogSoftmax over the lane axis (padded cols never affect it) ----
    m = jnp.max(logits, axis=1, keepdims=True)
    lse = jnp.log(jnp.sum(jnp.exp(logits - m), axis=1, keepdims=True)) + m
    # Store only the 10 real classes (masked vst; vst slot has ample slack here).
    o_ref[...] = (logits - lse)[:, :NUM_CLASSES]


@functools.partial(jax.jit, static_argnames=("tile_b",))
def mlp_forward(x, params, *, tile_b=1024):
    (w1, b1), (w2, b2), (w3, b3) = params
    B = x.shape[0]

    # Batch tile: cap at tile_b, keep it a sublane (8) multiple.  No wrapper-side
    # padding -- Pallas handles the partial last block (rows are independent).
    tb = min(tile_b, _round_up(B, 8))
    # v7x megacore: when the batch is big enough for two >=256-row tiles, cap tb
    # so the "parallel" grid axis has at least 2 steps (both TCs busy).
    if B >= 512:
        tb = min(tb, max(256, _round_up(pl.cdiv(B, 2), 256)))
    grid = (pl.cdiv(B, tb),)

    # Lane-dense final matmul: pad W3/b3 from 10 -> 128 output columns (tiny).
    w3p = jnp.pad(w3, ((0, 0), (0, OUT_LANES - NUM_CLASSES)))
    b3p = jnp.pad(b3, ((0, 0), (0, OUT_LANES - NUM_CLASSES)), constant_values=-1e30)

    # Advisory cost estimate so XLA schedules neighbouring ops sensibly.
    flops = 2 * B * (784 * 256 + 256 * 64 + 64 * OUT_LANES)
    bytes_accessed = (
        B * (784 * x.dtype.itemsize + NUM_CLASSES * 4)
        + (784 * 256 + 256 * 64 + 64 * OUT_LANES) * 2
        + (256 + 64 + OUT_LANES) * 4
    )
    transcendentals = B * OUT_LANES

    out = pl.pallas_call(
        mlp_kernel,
        out_shape=jax.ShapeDtypeStruct((B, NUM_CLASSES), jnp.float32),
        grid=grid,
        in_specs=[
            pl.BlockSpec((tb, 784), lambda i: (i, 0)),        # x tile
            pl.BlockSpec((784, 256), lambda i: (0, 0)),       # W1 (bf16)
            pl.BlockSpec((1, 256), lambda i: (0, 0)),         # b1 (f32)
            pl.BlockSpec((256, 64), lambda i: (0, 0)),        # W2 (bf16)
            pl.BlockSpec((1, 64), lambda i: (0, 0)),          # b2 (f32)
            pl.BlockSpec((64, OUT_LANES), lambda i: (0, 0)),  # W3 padded (bf16)
            pl.BlockSpec((1, OUT_LANES), lambda i: (0, 0)),   # b3 padded (f32)
        ],
        out_specs=pl.BlockSpec((tb, NUM_CLASSES), lambda i: (i, 0)),
        compiler_params=pltpu.CompilerParams(
            dimension_semantics=("parallel",),
        ),
        cost_estimate=pl.CostEstimate(
            flops=flops,
            transcendentals=transcendentals,
            bytes_accessed=bytes_accessed,
        ),
    )(x, w1, b1, w2, b2, w3p, b3p)
    return out


def init_params(key):
    # Deterministic init mimicking nn.Linear's U(-1/sqrt(fan_in), 1/sqrt(fan_in)).
    # Weights stored transposed vs. nn.Linear (shape (in, out)) and in bf16
    # (MXU-native); biases stay f32.
    dims = [(784, 256), (256, 64), (64, NUM_CLASSES)]
    params = []
    for fan_in, fan_out in dims:
        key, kw, kb = jax.random.split(key, 3)
        bound = 1.0 / jnp.sqrt(fan_in)
        w = jax.random.uniform(kw, (fan_in, fan_out), jnp.float32, -bound, bound)
        b = jax.random.uniform(kb, (1, fan_out), jnp.float32, -bound, bound)
        params.append((w.astype(jnp.bfloat16), b))
    return params


def mlp_reference(x, params):
    (w1, b1), (w2, b2), (w3, b3) = params
    h = jnp.dot(x.astype(w1.dtype), w1, preferred_element_type=jnp.float32) + b1
    h = jnp.maximum(h, 0.0)
    h = jnp.dot(h.astype(w2.dtype), w2, preferred_element_type=jnp.float32) + b2
    h = jnp.maximum(h, 0.0)
    logits = jnp.dot(h.astype(w3.dtype), w3, preferred_element_type=jnp.float32) + b3
    return jax.nn.log_softmax(logits, axis=1)


if __name__ == "__main__":
    key = jax.random.PRNGKey(0)
    key, k1, k2, k3 = jax.random.split(key, 4)
    params = init_params(key)

    # (1) small smoke test (grid=1), (2) ragged batch with a partial block,
    # (3) batch large enough to trigger the >=2-grid-step (megacore) path.
    for kx, B in ((k1, 8), (k2, 300), (k3, 600)):
        x = jax.random.normal(kx, (B, 784), jnp.float32)
        out = jax.block_until_ready(mlp_forward(x, params))
        ref = mlp_reference(x, params)
        assert out.shape == (B, NUM_CLASSES)
        err = float(jnp.max(jnp.abs(out - ref)))
        assert jnp.allclose(out, ref, atol=2e-3, rtol=2e-3), err

    print("KERNEL_OK")
</pallas_src>

<mosaic_0001>
module attributes {stable_mosaic.version = 11 : i64} {
  func.func @mlp_kernel(%arg0: i32, %arg1: memref<8x784xf32, #tpu.memory_space<vmem>>, %arg2: memref<784x256xbf16, #tpu.memory_space<vmem>>, %arg3: memref<1x256xf32, #tpu.memory_space<vmem>>, %arg4: memref<256x64xbf16, #tpu.memory_space<vmem>>, %arg5: memref<1x64xf32, #tpu.memory_space<vmem>>, %arg6: memref<64x128xbf16, #tpu.memory_space<vmem>>, %arg7: memref<1x128xf32, #tpu.memory_space<vmem>>, %arg8: memref<8x10xf32, #tpu.memory_space<vmem>>) attributes {dimension_semantics = [#tpu.dimension_semantics<parallel>], iteration_bounds = array<i64: 1>, scalar_prefetch = 0 : i64, scratch_operands = 0 : i64, tpu.core_type = #tpu.core_type<tc>, window_params = [{transform_indices = @transform_0, window_bounds = array<i64: 8, 784>}, {pipeline_mode = #tpu.pipeline_mode<synchronous>, transform_indices = @transform_1, window_bounds = array<i64: 784, 256>}, {pipeline_mode = #tpu.pipeline_mode<synchronous>, transform_indices = @transform_2, window_bounds = array<i64: 1, 256>}, {pipeline_mode = #tpu.pipeline_mode<synchronous>, transform_indices = @transform_3, window_bounds = array<i64: 256, 64>}, {pipeline_mode = #tpu.pipeline_mode<synchronous>, transform_indices = @transform_4, window_bounds = array<i64: 1, 64>}, {pipeline_mode = #tpu.pipeline_mode<synchronous>, transform_indices = @transform_5, window_bounds = array<i64: 64, 128>}, {pipeline_mode = #tpu.pipeline_mode<synchronous>, transform_indices = @transform_6, window_bounds = array<i64: 1, 128>}, {transform_indices = @transform_7, window_bounds = array<i64: 8, 10>}]} {
    %c0 = arith.constant 0 : index
    %c0_0 = arith.constant 0 : index
    %0 = vector.load %arg1[%c0, %c0_0] : memref<8x784xf32, #tpu.memory_space<vmem>>, vector<8x784xf32>
    %1 = arith.truncf %0 : vector<8x784xf32> to vector<8x784xbf16>
    %c0_1 = arith.constant 0 : index
    %c0_2 = arith.constant 0 : index
    %2 = vector.load %arg2[%c0_1, %c0_2] : memref<784x256xbf16, #tpu.memory_space<vmem>>, vector<784x256xbf16>
    %cst = arith.constant dense<0.000000e+00> : vector<8x256xf32>
    %3 = tpu.matmul %1, %2, %cst {dimension_numbers = #tpu.dot_dimension_numbers<[1], [0], [0], [1], [0, 0, 1, 1], [], []>} : vector<8x784xbf16>, vector<784x256xbf16>, vector<8x256xf32> -> vector<8x256xf32>
    %c0_3 = arith.constant 0 : index
    %c0_4 = arith.constant 0 : index
    %4 = vector.load %arg3[%c0_3, %c0_4] : memref<1x256xf32, #tpu.memory_space<vmem>>, vector<1x256xf32>
    %5 = vector.broadcast %4 : vector<1x256xf32> to vector<8x256xf32>
    %6 = arith.addf %3, %5 : vector<8x256xf32>
    %cst_5 = arith.constant 0.000000e+00 : f32
    %7 = vector.broadcast %cst_5 : f32 to vector<8x256xf32>
    %8 = arith.maximumf %6, %7 : vector<8x256xf32>
    %9 = arith.truncf %8 : vector<8x256xf32> to vector<8x256xbf16>
    %c0_6 = arith.constant 0 : index
    %c0_7 = arith.constant 0 : index
    %10 = vector.load %arg4[%c0_6, %c0_7] : memref<256x64xbf16, #tpu.memory_space<vmem>>, vector<256x64xbf16>
    %cst_8 = arith.constant dense<0.000000e+00> : vector<8x64xf32>
    %11 = tpu.matmul %9, %10, %cst_8 {dimension_numbers = #tpu.dot_dimension_numbers<[1], [0], [0], [1], [0, 0, 1, 1], [], []>} : vector<8x256xbf16>, vector<256x64xbf16>, vector<8x64xf32> -> vector<8x64xf32>
    %c0_9 = arith.constant 0 : index
    %c0_10 = arith.constant 0 : index
    %12 = vector.load %arg5[%c0_9, %c0_10] : memref<1x64xf32, #tpu.memory_space<vmem>>, vector<1x64xf32>
    %13 = vector.broadcast %12 : vector<1x64xf32> to vector<8x64xf32>
    %14 = arith.addf %11, %13 : vector<8x64xf32>
    %cst_11 = arith.constant 0.000000e+00 : f32
    %15 = vector.broadcast %cst_11 : f32 to vector<8x64xf32>
    %16 = arith.maximumf %14, %15 : vector<8x64xf32>
    %17 = arith.truncf %16 : vector<8x64xf32> to vector<8x64xbf16>
    %c0_12 = arith.constant 0 : index
    %c0_13 = arith.constant 0 : index
    %18 = vector.load %arg6[%c0_12, %c0_13] : memref<64x128xbf16, #tpu.memory_space<vmem>>, vector<64x128xbf16>
    %cst_14 = arith.constant dense<0.000000e+00> : vector<8x128xf32>
    %19 = tpu.matmul %17, %18, %cst_14 {dimension_numbers = #tpu.dot_dimension_numbers<[1], [0], [0], [1], [0, 0, 1, 1], [], []>} : vector<8x64xbf16>, vector<64x128xbf16>, vector<8x128xf32> -> vector<8x128xf32>
    %c0_15 = arith.constant 0 : index
    %c0_16 = arith.constant 0 : index
    %20 = vector.load %arg7[%c0_15, %c0_16] : memref<1x128xf32, #tpu.memory_space<vmem>>, vector<1x128xf32>
    %21 = vector.broadcast %20 : vector<1x128xf32> to vector<8x128xf32>
    %22 = arith.addf %19, %21 : vector<8x128xf32>
    %cst_17 = arith.constant dense<0xFF800000> : vector<8xf32>
    %23 = vector.multi_reduction <maximumf>, %22, %cst_17 [1] : vector<8x128xf32> to vector<8xf32>
    %24 = vector.shape_cast %23 : vector<8xf32> to vector<8x1xf32>
    %25 = vector.broadcast %24 : vector<8x1xf32> to vector<8x128xf32>
    %26 = arith.subf %22, %25 : vector<8x128xf32>
    %27 = math.exp %26 : vector<8x128xf32>
    %cst_18 = arith.constant dense<0.000000e+00> : vector<8xf32>
    %28 = vector.multi_reduction <add>, %27, %cst_18 [1] : vector<8x128xf32> to vector<8xf32>
    %29 = vector.shape_cast %28 : vector<8xf32> to vector<8x1xf32>
    %30 = math.log %29 : vector<8x1xf32>
    %31 = arith.addf %30, %24 : vector<8x1xf32>
    %32 = vector.broadcast %31 : vector<8x1xf32> to vector<8x128xf32>
    %33 = arith.subf %22, %32 : vector<8x128xf32>
    %34 = vector.extract_strided_slice %33 {offsets = [0, 0], sizes = [8, 10], strides = [1, 1]} : vector<8x128xf32> to vector<8x10xf32>
    %c0_19 = arith.constant 0 : index
    %c0_20 = arith.constant 0 : index
    %35 = vector.load %arg8[%c0_19, %c0_20] : memref<8x10xf32, #tpu.memory_space<vmem>>, vector<8x10xf32>
    tpu.vector_store %arg8[%c0_19, %c0_20], %34 {strides = array<i32>} : memref<8x10xf32, #tpu.memory_space<vmem>>, vector<8x10xf32>,
    return
  }
  func.func @transform_0(%arg0: i32) -> (i32, i32) {
    %c0_i32 = arith.constant 0 : i32
    %c0_i32_0 = arith.constant 0 : i32
    return %arg0, %c0_i32 : i32, i32
  }
  func.func @transform_1(%arg0: i32) -> (i32, i32) {
    %c0_i32 = arith.constant 0 : i32
    %c0_i32_0 = arith.constant 0 : i32
    %c0_i32_1 = arith.constant 0 : i32
    return %c0_i32, %c0_i32_0 : i32, i32
  }
  func.func @transform_2(%arg0: i32) -> (i32, i32) {
    %c0_i32 = arith.constant 0 : i32
    %c0_i32_0 = arith.constant 0 : i32
    %c0_i32_1 = arith.constant 0 : i32
    return %c0_i32, %c0_i32_0 : i32, i32
  }
  func.func @transform_3(%arg0: i32) -> (i32, i32) {
    %c0_i32 = arith.constant 0 : i32
    %c0_i32_0 = arith.constant 0 : i32
    %c0_i32_1 = arith.constant 0 : i32
    return %c0_i32, %c0_i32_0 : i32, i32
  }
  func.func @transform_4(%arg0: i32) -> (i32, i32) {
    %c0_i32 = arith.constant 0 : i32
    %c0_i32_0 = arith.constant 0 : i32
    %c0_i32_1 = arith.constant 0 : i32
    return %c0_i32, %c0_i32_0 : i32, i32
  }
  func.func @transform_5(%arg0: i32) -> (i32, i32) {
    %c0_i32 = arith.constant 0 : i32
    %c0_i32_0 = arith.constant 0 : i32
    %c0_i32_1 = arith.constant 0 : i32
    return %c0_i32, %c0_i32_0 : i32, i32
  }
  func.func @transform_6(%arg0: i32) -> (i32, i32) {
    %c0_i32 = arith.constant 0 : i32
    %c0_i32_0 = arith.constant 0 : i32
    %c0_i32_1 = arith.constant 0 : i32
    return %c0_i32, %c0_i32_0 : i32, i32
  }
  func.func @transform_7(%arg0: i32) -> (i32, i32) {
    %c0_i32 = arith.constant 0 : i32
    %c0_i32_0 = arith.constant 0 : i32
    return %arg0, %c0_i32 : i32, i32
  }
}

</mosaic_0001>

<bundles_post_ra>
// kernel: mlp_forward.1
= control target key start
LH: loop header
LB: loop body
LE: loop exit
PB: predicated region body
PF: predicated region fallthrough
CT: control target
= control target key end

     0   :  { %12 = vsyncpa [#allocation3], 0  ;;  %s1643_s0 = inlined_call_operand.vmem [shape: f32[8,784], index: 0, kind: input, shape index: {}]   ;;  %s1644_s1 = inlined_call_operand.hbm [shape: bf16[784,256], index: 1, kind: input, shape index: {}]   ;;  %s1645_s2 = inlined_call_operand.vmem [shape: f32[1,256], index: 2, kind: input, shape index: {}]   ;;  %s1646_s3 = inlined_call_operand.vmem [shape: bf16[256,64], index: 3, kind: input, shape index: {}]   ;;  %s1647_s4 = inlined_call_operand.vmem [shape: f32[1,64], index: 4, kind: input, shape index: {}]   ;;  %s1648_s5 = inlined_call_operand.vmem [shape: bf16[64,128], index: 5, kind: input, shape index: {}]   ;;  %s1649_s6 = inlined_call_operand.vmem [shape: f32[1,128], index: 6, kind: input, shape index: {}]   ;;  %s1650_s7 = inlined_call_operand.hbm [shape: f32[8,10], index: 7, kind: output, shape index: {}]  }
   0x1   :  { %13 = vsyncpa [#allocation4], 0  ;;  %s1499_s24 = smov [#allocation2]  }
   0x2   :  { %s21_s25 = sshll.u32 %s1499_s24, 4  ;;  %s22_s25 = int_to_ptr.vmem [resolvable:$true] %s21_s25 }
   0x3   :  { %s1463_s26 = scalar_lea.vmem %s22_s25, 12544  ;;  %p1468_p1 = scmp.lt.s32.totalorder %s22_s25, %s22_s25 }
   0x4   :  { %p1464_p0 = scmp.ne.s32.totalorder %s22_s25, %s1463_s26  ;;  %p1469_p2 = scmp.lt.s32.totalorder %s1463_s26, %s1463_s26 }
   0x6   :  { %p1470_p3 = por %p1469_p2, %p1468_p1 }
   0x8   :  { %p1471_p4 = pnand %p1470_p3, %p1464_p0 }
   0xa   :  { %1474 = shalt.err (!%p1471_p4)
}
   0xb   :  { %s1500_s27 = smov 128   ;;  %s1501_s28 = smov 8  }
   0xc   :  { %27 = dma.hbm_to_vmem [thread:$0]  %s1644_s1, 12544, %s22_s25, [#allocation3], %s1500_s27, %s1500_s27, %s1501_s28  }
   0xd   :  { %1495 = dma.done.wait [#allocation3], 12544  }
   0xe   :  { %1496 = vsyncadd [#allocation3], 4294954752  ;;  %v1284_v0 = vld [vmem:[#allocation2 + $0x74] ss:$8 sps:$4 sm:$0xff]   ;;  %v1286_v1 = vld [vmem:[#allocation2 + $0x70] ss:$8 sps:$4 sm:$0xff]  }
   0xf   :  { %660 = vmatprep.subr.bf16.mxu0 %v1284_v0  ;;  %v1287_v2 = vld [vmem:[#allocation2 + $0x174] ss:$8 sps:$4 sm:$0xff]   ;;  %v1289_v3 = vld [vmem:[#allocation2 + $0x170] ss:$8 sps:$4 sm:$0xff]   ;;  %v1290_v4 = vld [vmem:[#allocation2 + $0x64] ss:$8 sps:$4 sm:$0xff]  }
  0x10   :  { %661 = vmatpush1.bf16.msra.mxu0 %v1286_v1  ;;  %v1292_v5 = vld [vmem:[#allocation2 + $0x60] ss:$8 sps:$4 sm:$0xff]   ;;  %701 = vmatprep.subr.bf16.mxu1 %v1287_v2  ;;  %v1293_v6 = vld [vmem:[#allocation2 + $0x164] ss:$8 sps:$4 sm:$0xff]   ;;  %v1296_v8 = vld [vmem:[#allocation2 + $0x54] ss:$8 sps:$4 sm:$0xff]  }
  0x11   :  { %702 = vmatpush1.bf16.msra.mxu1 %v1289_v3  ;;  %662 = vmatprep.subr.bf16.mxu0 %v1290_v4  ;;  %v1295_v7 = vld [vmem:[#allocation2 + $0x160] ss:$8 sps:$4 sm:$0xff]   ;;  %v1298_v9 = vld [vmem:[#allocation2 + $0x50] ss:$8 sps:$4 sm:$0xff]   ;;  %v1299_v10 = vld [vmem:[#allocation2 + $0x154] ss:$8 sps:$4 sm:$0xff]  }
  0x12   :  { %703 = vmatprep.subr.bf16.mxu1 %v1293_v6  ;;  %v1302_v11 = vld [vmem:[#allocation2 + $0x44] ss:$8 sps:$4 sm:$0xff]   ;;  %v1301_v12 = vld [vmem:[#allocation2 + $0x150] ss:$8 sps:$4 sm:$0xff]   ;;  %v1304_v14 = vld [vmem:[#allocation2 + $0x40] ss:$8 sps:$4 sm:$0xff]  }
  0x13   :  { %v1305_v13 = vld [vmem:[#allocation2 + $0x144] ss:$8 sps:$4 sm:$0xff]   ;;  %v1308_v15 = vld [vmem:[#allocation2 + $0x34] ss:$8 sps:$4 sm:$0xff]   ;;  %v1307_v16 = vld [vmem:[#allocation2 + $0x140] ss:$8 sps:$4 sm:$0xff]  }
  0x14   :  { %663 = vmatpush1.bf16.msra.mxu0 %v1292_v5  ;;  %v1311_v17 = vld [vmem:[#allocation2 + $0x134] ss:$8 sps:$4 sm:$0xff]   ;;  %v1310_v18 = vld [vmem:[#allocation2 + $0x30] ss:$8 sps:$4 sm:$0xff]   ;;  %v1314_v19 = vld [vmem:[#allocation2 + $0x24] ss:$8 sps:$4 sm:$0xff]  }
  0x15   :  { %664 = vmatprep.subr.bf16.mxu0 %v1296_v8  ;;  %704 = vmatpush1.bf16.msra.mxu1 %v1295_v7  ;;  %v1313_v20 = vld [vmem:[#allocation2 + $0x130] ss:$8 sps:$4 sm:$0xff]   ;;  %v1317_v21 = vld [vmem:[#allocation2 + $0x124] ss:$8 sps:$4 sm:$0xff]   ;;  %v1316_v22 = vld [vmem:[#allocation2 + $0x20] ss:$8 sps:$4 sm:$0xff]  }
  0x16   :  { %705 = vmatprep.subr.bf16.mxu1 %v1299_v10  ;;  %v1320_v23 = vld [vmem:[#allocation2 + $0x14] ss:$8 sps:$4 sm:$0xff]   ;;  %v1319_v24 = vld [vmem:[#allocation2 + $0x120] ss:$8 sps:$4 sm:$0xff]   ;;  %v1322_v26 = vld [vmem:[#allocation2 + $0x10] ss:$8 sps:$4 sm:$0xff]  }
  0x17   :  { %v1323_v25 = vld [vmem:[#allocation2 + $0x114] ss:$8 sps:$4 sm:$0xff]   ;;  %v1326_v27 = vld [vmem:[#allocation2 + $0x4] ss:$8 sps:$4 sm:$0xff]   ;;  %v1325_v28 = vld [vmem:[#allocation2 + $0x110] ss:$8 sps:$4 sm:$0xff]  }
  0x18   :  { %665 = vmatpush1.bf16.msra.mxu0 %v1298_v9  ;;  %v1329_v29 = vld [vmem:[#allocation2 + $0x104] ss:$8 sps:$4 sm:$0xff]   ;;  %v1328_v30 = vld [vmem:[#allocation2] ss:$8 sps:$4 sm:$0xff]   ;;  %v1332_v31 = vld [vmem:[#allocation2 + $0xf4] ss:$8 sps:$4 sm:$0xff]  }
  0x19   :  { %666 = vmatprep.subr.bf16.mxu0 %v1302_v11  ;;  %706 = vmatpush1.bf16.msra.mxu1 %v1301_v12  ;;  %v1331_v32 = vld [vmem:[#allocation2 + $0x100] ss:$8 sps:$4 sm:$0xff]   ;;  %v1335_v33 = vld [vmem:[#allocation2 + $0x1f4] ss:$8 sps:$4 sm:$0xff]   ;;  %v1334_v34 = vld [vmem:[#allocation2 + $0xf0] ss:$8 sps:$4 sm:$0xff]  }
  0x1a   :  { %707 = vmatprep.subr.bf16.mxu1 %v1305_v13  ;;  %v1338_v35 = vld [vmem:[#allocation2 + $0xe4] ss:$8 sps:$4 sm:$0xff]   ;;  %v1337_v36 = vld [vmem:[#allocation2 + $0x1f0] ss:$8 sps:$4 sm:$0xff]   ;;  %v1340_v38 = vld [vmem:[#allocation2 + $0xe0] ss:$8 sps:$4 sm:$0xff]  }
  0x1b   :  { %v1341_v37 = vld [vmem:[#allocation2 + $0x1e4] ss:$8 sps:$4 sm:$0xff]   ;;  %v1344_v39 = vld [vmem:[#allocation2 + $0xd4] ss:$8 sps:$4 sm:$0xff]   ;;  %v1343_v40 = vld [vmem:[#allocation2 + $0x1e0] ss:$8 sps:$4 sm:$0xff]  }
  0x1c   :  { %667 = vmatpush1.bf16.msra.mxu0 %v1304_v14  ;;  %v1347_v41 = vld [vmem:[#allocation2 + $0x1d4] ss:$8 sps:$4 sm:$0xff]   ;;  %v1346_v42 = vld [vmem:[#allocation2 + $0xd0] ss:$8 sps:$4 sm:$0xff]   ;;  %v1350_v43 = vld [vmem:[#allocation2 + $0xc4] ss:$8 sps:$4 sm:$0xff]  }
  0x1d   :  { %668 = vmatprep.subr.bf16.mxu0 %v1308_v15  ;;  %708 = vmatpush1.bf16.msra.mxu1 %v1307_v16  ;;  %v1349_v44 = vld [vmem:[#allocation2 + $0x1d0] ss:$8 sps:$4 sm:$0xff]   ;;  %v1353_v45 = vld [vmem:[#allocation2 + $0x1c4] ss:$8 sps:$4 sm:$0xff]   ;;  %v1352_v47 = vld [vmem:[#allocation2 + $0xc0] ss:$8 sps:$4 sm:$0xff]  }
  0x1e   :  { %709 = vmatprep.subr.bf16.mxu1 %v1311_v17  ;;  %v43_v46 = vld [vmem:[%s1643_s0 + $0x8] sm:$0xff]  ;;  %v1356_v49 = vld [vmem:[#allocation2 + $0xb4] ss:$8 sps:$4 sm:$0xff]   ;;  %v1358_v54 = vld [vmem:[#allocation2 + $0xb0] ss:$8 sps:$4 sm:$0xff]   ;;  %vm656_vm0 = vcmask 130048  }
  0x1f   :  { %v50_v48 = vpack.c.bf16 %v43_v46, %v43_v46  ;;  %v45_v50 = vld [vmem:[%s1643_s0 + $0x18] sm:$0xff]  ;;  %v1355_v51 = vld [vmem:[#allocation2 + $0x1c0] ss:$8 sps:$4 sm:$0xff]   ;;  %v1362_v55 = vld [vmem:[#allocation2 + $0xa4] ss:$8 sps:$4 sm:$0xff]   ;;  %vm1504_vm1 = vmmov 0  }
  0x20   :  { %669 = vmatpush1.bf16.msra.mxu0 %v1310_v18  ;;  %v52_v52 = vpack.c.bf16 %v45_v50, %v45_v50  ;;  %v1359_v53 = vld [vmem:[#allocation2 + $0x1b4] ss:$8 sps:$4 sm:$0xff]   ;;  %v1361_v56 = vld [vmem:[#allocation2 + $0x1b0] ss:$8 sps:$4 sm:$0xff]   ;;  %v1365_v57 = vld [vmem:[#allocation2 + $0x1a4] ss:$8 sps:$4 sm:$0xff]  }
  0x21   :  { %670 = vmatprep.subr.bf16.mxu0 %v1314_v19  ;;  %710 = vmatpush1.bf16.msra.mxu1 %v1313_v20  ;;  %v1364_v58 = vld [vmem:[#allocation2 + $0xa0] ss:$8 sps:$4 sm:$0xff]   ;;  %v1368_v59 = vld [vmem:[#allocation2 + $0x94] ss:$8 sps:$4 sm:$0xff]   ;;  %v1370_v62 = vld [vmem:[#allocation2 + $0x90] ss:$8 sps:$4 sm:$0xff]  }
  0x22   :  { %711 = vmatprep.subr.bf16.mxu1 %v1317_v21  ;;  %692 = vmatprep.mubr.bf16.mxu0 %v50_v48  ;;  %v1367_v60 = vld [vmem:[#allocation2 + $0x1a0] ss:$8 sps:$4 sm:$0xff]   ;;  %v1371_v61 = vld [vmem:[#allocation2 + $0x194] ss:$8 sps:$4 sm:$0xff]   ;;  %v1374_v63 = vld [vmem:[#allocation2 + $0x84] ss:$8 sps:$4 sm:$0xff]  }
  0x23   :  { %733 = vmatprep.mubr.bf16.mxu1 %v52_v52  ;;  %v1373_v0 = vld [vmem:[#allocation2 + $0x190] ss:$8 sps:$4 sm:$0xff]   ;;  %v1376_v1 = vld [vmem:[#allocation2 + $0x80] ss:$8 sps:$4 sm:$0xff]   ;;  %v1377_v2 = vld [vmem:[#allocation2 + $0x184] ss:$8 sps:$4 sm:$0xff]  }
  0x24   :  { %671 = vmatpush1.bf16.msra.mxu0 %v1316_v22  ;;  %v1379_v3 = vld [vmem:[#allocation2 + $0x180] ss:$8 sps:$4 sm:$0xff]   ;;  %v1382_v5 = vld [vmem:[#allocation2 + $0x274] ss:$8 sps:$4 sm:$0xff]   ;;  %v1380_v8 = vld [vmem:[#allocation2 + $0x270] ss:$8 sps:$4 sm:$0xff]  }
  0x25   :  { %672 = vmatprep.subr.bf16.mxu0 %v1320_v23  ;;  %712 = vmatpush1.bf16.msra.mxu1 %v1319_v24  ;;  %v42_v4 = vld [vmem:[%s1643_s0] sm:$0xff]  ;;  %v44_v6 = vld [vmem:[%s1643_s0 + $0x10] sm:$0xff]  ;;  %v47_v16 = vld [vmem:[%s1643_s0 + $0x28] sm:$0xff]  ;;  %v1502_v19 = vmov 0   ;;  %vm1044_vm2 = vcmask 523264   ;;  %vm1099_vm3 = vcmask 80896  }
  0x26   :  { %713 = vmatprep.subr.bf16.mxu1 %v1323_v25  ;;  %v49_v7 = vpack.c.bf16 %v42_v4, %v42_v4  ;;  %v1385_v9 = vld [vmem:[#allocation2 + $0x264] ss:$8 sps:$4 sm:$0xff]   ;;  %v51_v10 = vpack.c.bf16 %v44_v6, %v44_v6  ;;  %v1425_v11 = vld [vmem:[#allocation2 + $0x300] ss:$8 sps:$4 sm:$0xff]   ;;  %v1388_v14 = vld [vmem:[#allocation2 + $0x254] ss:$8 sps:$4 sm:$0xff]   ;;  %v54_v17 = vpack.c.bf16 %v47_v16, %v47_v16 }
  0x27   :  { %v1427_v12 = vld [vmem:[#allocation2 + $0x304] ss:$8 sps:$4 sm:$0xff]   ;;  %v1383_v13 = vld [vmem:[#allocation2 + $0x260] ss:$8 sps:$4 sm:$0xff]   ;;  %v48_v15 = vld [vmem:[%s1643_s0 + $0x30] sm:$0xff] }
  0x28   :  { %673 = vmatpush1.bf16.msra.mxu0 %v1322_v26  ;;  %v1386_v18 = vld [vmem:[#allocation2 + $0x250] ss:$8 sps:$4 sm:$0xff]   ;;  %v1391_v20 = vld [vmem:[#allocation2 + $0x244] ss:$8 sps:$4 sm:$0xff]   ;;  %v55_v21 = vpack.c.bf16 %v48_v15, %v48_v15  ;;  %v1389_v22 = vld [vmem:[#allocation2 + $0x240] ss:$8 sps:$4 sm:$0xff]  }
  0x29   :  { %674 = vmatprep.subr.bf16.mxu0 %v1326_v27  ;;  %714 = vmatpush1.bf16.msra.mxu1 %v1325_v28  ;;  %v1394_v23 = vld [vmem:[#allocation2 + $0x234] ss:$8 sps:$4 sm:$0xff]   ;;  %v1392_v24 = vld [vmem:[#allocation2 + $0x230] ss:$8 sps:$4 sm:$0xff]   ;;  %v1397_v25 = vld [vmem:[#allocation2 + $0x224] ss:$8 sps:$4 sm:$0xff]  }
  0x2a   :  { %715 = vmatprep.subr.bf16.mxu1 %v1329_v29  ;;  %v1395_v26 = vld [vmem:[#allocation2 + $0x220] ss:$8 sps:$4 sm:$0xff]   ;;  %v1400_v27 = vld [vmem:[#allocation2 + $0x214] ss:$8 sps:$4 sm:$0xff]   ;;  %v1398_v28 = vld [vmem:[#allocation2 + $0x210] ss:$8 sps:$4 sm:$0xff]  }
  0x2b   :  { %v1403_v29 = vld [vmem:[#allocation2 + $0x204] ss:$8 sps:$4 sm:$0xff]   ;;  %v1428_v46 = vld [vmem:[#allocation2 + $0x280] ss:$8 sps:$4 sm:$0xff]   ;;  %v1432_v50 = vld [vmem:[%s1646_s3 + $0x38] sm:$0xff]  }
  0x2c   :  { %675 = vmatpush1.bf16.msra.mxu0 %v1328_v30  ;;  %v1401_v30 = vld [vmem:[#allocation2 + $0x200] ss:$8 sps:$4 sm:$0xff]   ;;  %v1434_v52 = vld [vmem:[%s1646_s3 + $0x30] sm:$0xff]  }
  0x2d   :  { %676 = vmatprep.subr.bf16.mxu0 %v1332_v31  ;;  %716 = vmatpush1.bf16.msra.mxu1 %v1331_v32  ;;  %v1406_v31 = vld [vmem:[#allocation2 + $0x2f4] ss:$8 sps:$4 sm:$0xff]   ;;  %v1404_v32 = vld [vmem:[#allocation2 + $0x2f0] ss:$8 sps:$4 sm:$0xff]  }
  0x2e   :  { %717 = vmatprep.subr.bf16.mxu1 %v1335_v33  ;;  %v1409_v33 = vld [vmem:[#allocation2 + $0x2e4] ss:$8 sps:$4 sm:$0xff]  }
  0x30   :  { %677 = vmatpush2.bf16.msra.mxu0 %v1334_v34  ;;  %v1407_v34 = vld [vmem:[#allocation2 + $0x2e0] ss:$8 sps:$4 sm:$0xff]  }
  0x31   :  { %678 = vmatprep.subr.bf16.mxu0 %v1338_v35  ;;  %718 = vmatpush2.bf16.msra.mxu1 %v1337_v36  ;;  %v1412_v35 = vld [vmem:[#allocation2 + $0x2d4] ss:$8 sps:$4 sm:$0xff]   ;;  %v1410_v36 = vld [vmem:[#allocation2 + $0x2d0] ss:$8 sps:$4 sm:$0xff]  }
  0x32   :  { %719 = vmatprep.subr.bf16.mxu1 %v1341_v37  ;;  %v1415_v37 = vld [vmem:[#allocation2 + $0x2c4] ss:$8 sps:$4 sm:$0xff]  }
  0x34   :  { %679 = vmatpush2.bf16.msra.mxu0 %v1340_v38  ;;  %v1413_v38 = vld [vmem:[#allocation2 + $0x2c0] ss:$8 sps:$4 sm:$0xff]  }
  0x35   :  { %680 = vmatprep.subr.bf16.mxu0 %v1344_v39  ;;  %720 = vmatpush2.bf16.msra.mxu1 %v1343_v40  ;;  %v1418_v39 = vld [vmem:[#allocation2 + $0x2b4] ss:$8 sps:$4 sm:$0xff]   ;;  %v1416_v40 = vld [vmem:[#allocation2 + $0x2b0] ss:$8 sps:$4 sm:$0xff]  }
  0x36   :  { %721 = vmatprep.subr.bf16.mxu1 %v1347_v41  ;;  %v1421_v41 = vld [vmem:[#allocation2 + $0x2a4] ss:$8 sps:$4 sm:$0xff]  }
  0x38   :  { %681 = vmatpush2.bf16.msra.mxu0 %v1346_v42  ;;  %v1419_v42 = vld [vmem:[#allocation2 + $0x2a0] ss:$8 sps:$4 sm:$0xff]  }
  0x39   :  { %682 = vmatprep.subr.bf16.mxu0 %v1350_v43  ;;  %722 = vmatpush2.bf16.msra.mxu1 %v1349_v44  ;;  %v1424_v43 = vld [vmem:[#allocation2 + $0x294] ss:$8 sps:$4 sm:$0xff]   ;;  %v1422_v44 = vld [vmem:[#allocation2 + $0x290] ss:$8 sps:$4 sm:$0xff]  }
  0x3a   :  { %723 = vmatprep.subr.bf16.mxu1 %v1353_v45  ;;  %v1430_v45 = vld [vmem:[#allocation2 + $0x284] ss:$8 sps:$4 sm:$0xff]  }
  0x3c   :  { %683 = vmatpush2.bf16.msra.mxu0 %v1352_v47  ;;  %v46_v47 = vld [vmem:[%s1643_s0 + $0x20] sm:$0xff] }
  0x3d   :  { %684 = vmatprep.subr.bf16.mxu0 %v1356_v49  ;;  %724 = vmatpush2.bf16.msra.mxu1 %v1355_v51  ;;  %v53_v48 = vpack.c.bf16 %v46_v47, %v46_v47  ;;  %v1431_v49 = vld [vmem:[%s1646_s3 + $0x78] sm:$0xff]   ;;  %v1433_v51 = vld [vmem:[%s1646_s3 + $0x70] sm:$0xff]  }
  0x3e   :  { %725 = vmatprep.subr.bf16.mxu1 %v1359_v53  ;;  %v1435_v53 = vld [vmem:[%s1646_s3 + $0x68] sm:$0xff]  }
  0x40   :  { %685 = vmatpush2.bf16.msra.mxu0 %v1358_v54  ;;  %v1436_v54 = vld [vmem:[%s1646_s3 + $0x28] sm:$0xff]  }
  0x41   :  { %686 = vmatprep.subr.bf16.mxu0 %v1362_v55  ;;  %726 = vmatpush2.bf16.msra.mxu1 %v1361_v56  ;;  %v1437_v55 = vld [vmem:[%s1646_s3 + $0x60] sm:$0xff]  }
  0x42   :  { %727 = vmatprep.subr.bf16.mxu1 %v1365_v57  ;;  %v1438_v56 = vld [vmem:[%s1646_s3 + $0x20] sm:$0xff]   ;;  %v1439_v57 = vld [vmem:[%s1646_s3 + $0x58] sm:$0xff]  }
  0x44   :  { %687 = vmatpush2.bf16.msra.mxu0 %v1364_v58  ;;  %v1440_v58 = vld [vmem:[%s1646_s3 + $0x18] sm:$0xff]  }
  0x45   :  { %688 = vmatprep.subr.bf16.mxu0 %v1368_v59  ;;  %728 = vmatpush2.bf16.msra.mxu1 %v1367_v60  ;;  %v1441_v59 = vld [vmem:[%s1646_s3 + $0x50] sm:$0xff]  }
  0x46   :  { %729 = vmatprep.subr.bf16.mxu1 %v1371_v61  ;;  %v1442_v60 = vld [vmem:[%s1646_s3 + $0x10] sm:$0xff]   ;;  %v1443_v61 = vld [vmem:[%s1646_s3 + $0x48] sm:$0xff]  }
  0x48   :  { %689 = vmatpush2.bf16.msra.mxu0 %v1370_v62  ;;  %v1444_v62 = vld [vmem:[%s1646_s3 + $0x8] sm:$0xff]  }
  0x49   :  { %690 = vmatprep.subr.bf16.mxu0 %v1374_v63  ;;  %730 = vmatpush2.bf16.msra.mxu1 %v1373_v0  ;;  %v1445_v63 = vld [vmem:[%s1646_s3 + $0x40] sm:$0xff]  }
  0x4a   :  { %731 = vmatprep.subr.bf16.mxu1 %v1377_v2  ;;  %v1446_v0 = vld [vmem:[%s1646_s3] sm:$0xff]  }
  0x4c   :  { %691 = vmatpush2.bf16.msra.mxu0 %v1376_v1  ;;  %v1503_v1 = vmov 0.0  }
  0x4d   :  { %742 = vmatprep.subr.bf16.mxu0 %v1382_v5  ;;  %732 = vmatpush2.bf16.msra.mxu1 %v1379_v3 }
  0x4e   :  { %797 = vmatprep.subr.bf16.mxu1 %v1427_v12 }
  0x4f   :  { %693 = vmatmul.mubr.bf16.vlgmr.msra.gmra.mxu0 %v49_v7 }
  0x50   :  { %743 = vmatpush1.bf16.msra.mxu0 %v1380_v8  ;;  %734 = vmatmul.mubr.bf16.vlgmr.msra.gmra.mxu1 %v51_v10 }
  0x51   :  { %744 = vmatprep.subr.bf16.mxu0 %v1385_v9  ;;  %798 = vmatpush1.bf16.msra.mxu1 %v1425_v11 }
  0x52   :  { %815 = vmatprep.mubr.bf16.mxu1 %v1502_v19  ;;  %774 = vmatprep.mubr.bf16.mxu0 %v54_v17  ;;  %v154_v17 = vld [vmem:[%s1645_s2] sm:$0x3] }
  0x53   :  { %1238 = vmatprep.subr.bf16.mxu1 %v1431_v49 }
  0x54   :  { %745 = vmatpush1.bf16.msra.mxu0 %v1383_v13 }
  0x55   :  { %746 = vmatprep.subr.bf16.mxu0 %v1388_v14  ;;  %v156_v14 = vlaneseq }
  0x57   :  { %v157_v15 = vshrl.u32 %v156_v14, 7 }
  0x58   :  { %747 = vmatpush1.bf16.msra.mxu0 %v1386_v18  ;;  %1214 = vmatmul.mubr.msk.bf16.vlgmr.msra.gmra.mxu1 %vm656_vm0, %v55_v21 }
  0x59   :  { %748 = vmatprep.subr.bf16.mxu0 %v1391_v20  ;;  %1239 = vmatpush3.bf16.msra.mxu1 %v1432_v50  ;;  %v158_v16 = vsub.s32 0, %v157_v15  ;;  %v162_v18 = vsub.s32 1, %v157_v15  ;;  %v1232_v50 = vld [vmem:[%s1649_s6] ss:$0 sm:$0xff] }
  0x5a   :  { %1240 = vmatprep.subr.bf16.mxu1 %v1433_v51 }
  0x5b   :  { %v159_v19 = vrot.slane %v154_v17, %v158_v16  ;;  %v163_v20 = vrot.slane %v154_v17, %v162_v18 }
  0x5c   :  { %749 = vmatpush1.bf16.msra.mxu0 %v1389_v22 }
  0x5d   :  { %750 = vmatprep.subr.bf16.mxu0 %v1394_v23  ;;  %1241 = vmatpush3.bf16.msra.mxu1 %v1434_v52 }
  0x5e   :  { %1242 = vmatprep.subr.bf16.mxu1 %v1435_v53 }
  0x60   :  { %751 = vmatpush1.bf16.msra.mxu0 %v1392_v24 }
  0x61   :  { %752 = vmatprep.subr.bf16.mxu0 %v1397_v25  ;;  %1243 = vmatpush3.bf16.msra.mxu1 %v1436_v54 }
  0x62   :  { %1244 = vmatprep.subr.bf16.mxu1 %v1437_v55 }
  0x64   :  { %753 = vmatpush1.bf16.msra.mxu0 %v1395_v26 }
  0x65   :  { %754 = vmatprep.subr.bf16.mxu0 %v1400_v27  ;;  %1245 = vmatpush3.bf16.msra.mxu1 %v1438_v56 }
  0x66   :  { %1246 = vmatprep.subr.bf16.mxu1 %v1439_v57 }
  0x68   :  { %755 = vmatpush1.bf16.msra.mxu0 %v1398_v28 }
  0x69   :  { %756 = vmatprep.subr.bf16.mxu0 %v1403_v29  ;;  %1247 = vmatpush3.bf16.msra.mxu1 %v1440_v58 }
  0x6a   :  { %1248 = vmatprep.subr.bf16.mxu1 %v1441_v59 }
  0x6c   :  { %757 = vmatpush1.bf16.msra.mxu0 %v1401_v30 }
  0x6d   :  { %758 = vmatprep.subr.bf16.mxu0 %v1406_v31  ;;  %1249 = vmatpush3.bf16.msra.mxu1 %v1442_v60 }
  0x6e   :  { %1250 = vmatprep.subr.bf16.mxu1 %v1443_v61 }
  0x70   :  { %759 = vmatpush2.bf16.msra.mxu0 %v1404_v32 }
  0x71   :  { %760 = vmatprep.subr.bf16.mxu0 %v1409_v33  ;;  %1251 = vmatpush3.bf16.msra.mxu1 %v1444_v62 }
  0x72   :  { %1252 = vmatprep.subr.bf16.mxu1 %v1445_v63 }
  0x74   :  { %761 = vmatpush2.bf16.msra.mxu0 %v1407_v34 }
  0x75   :  { %762 = vmatprep.subr.bf16.mxu0 %v1412_v35  ;;  %1253 = vmatpush3.bf16.msra.mxu1 %v1446_v0 }
  0x76   :  { %1265 = vmatprep.subr.bf16.mxu1 %v1503_v1 }
  0x78   :  { %763 = vmatpush2.bf16.msra.mxu0 %v1410_v36  ;;  %v1447_v36 = vld [vmem:[%s1648_s5 + $0x18] sm:$0xff]  }
  0x79   :  { %764 = vmatprep.subr.bf16.mxu0 %v1415_v37 }
  0x7c   :  { %765 = vmatpush2.bf16.msra.mxu0 %v1413_v38  ;;  %v1448_v38 = vld [vmem:[%s1648_s5 + $0x10] sm:$0xff]  }
  0x7d   :  { %766 = vmatprep.subr.bf16.mxu0 %v1418_v39  ;;  %v1449_v39 = vld [vmem:[%s1648_s5 + $0x8] sm:$0xff]  }
  0x80   :  { %767 = vmatpush2.bf16.msra.mxu0 %v1416_v40  ;;  %v1450_v40 = vld [vmem:[%s1648_s5] sm:$0xff]  }
  0x81   :  { %768 = vmatprep.subr.bf16.mxu0 %v1421_v41 }
  0x84   :  { %769 = vmatpush2.bf16.msra.mxu0 %v1419_v42  ;;  %v1215_v42 = vld [vmem:[%s1647_s4] ss:$0 sm:$0xff]  ;;  %s1505_s4 = smov [#allocation5]  }
  0x85   :  { %770 = vmatprep.subr.bf16.mxu0 %v1424_v43  ;;  %s1107_s5 = sshll.u32 %s1505_s4, 4  ;;  %s1108_s5 = int_to_ptr.vmem [resolvable:$true] %s1107_s5 }
  0x86   :  { %s1475_s6 = scalar_lea.vmem %s1108_s5, 128  ;;  %p1480_p6 = scmp.lt.s32.totalorder %s1108_s5, %s1108_s5 }
  0x87   :  { %p1476_p5 = scmp.ne.s32.totalorder %s1108_s5, %s1475_s6  ;;  %p1481_p7 = scmp.lt.s32.totalorder %s1475_s6, %s1475_s6 }
  0x88   :  { %771 = vmatpush2.bf16.msra.mxu0 %v1422_v44 }
  0x89   :  { %772 = vmatprep.subr.bf16.mxu0 %v1430_v45  ;;  %p1482_p8 = por %p1481_p7, %p1480_p6 }
  0x8b   :  { %p1483_p9 = pnand %p1482_p8, %p1476_p5 }
  0x8c   :  { %773 = vmatpush2.bf16.msra.mxu0 %v1428_v46 }
  0x8f   :  { %775 = vmatmul.mubr.bf16.vlgmr.msra.gmra.mxu0 %v53_v48 }
 0x10f   :  { %v694_v2 = vpop.f32.mrf.mxu0 }
 0x110   :  { %v735_v4 = vpop.f32.mrf.mxu1  ;;  %v695_v21 = vadd.f32 %v694_v2, %v159_v19 }
 0x111   :  { %v696_v3 = vpop.f32.mrf.mxu0 }
 0x112   :  { %v737_v6 = vpop.f32.mrf.mxu1  ;;  %v697_v22 = vadd.f32 %v696_v3, %v163_v20  ;;  %v736_v23 = vadd.f32 %v735_v4, %v695_v21 }
 0x113   :  { %v698_v5 = vpop.f32.mrf.mxu0 }
 0x114   :  { %v739_v8 = vpop.f32.mrf.mxu1  ;;  %v738_v25 = vadd.f32 %v737_v6, %v697_v22 }
 0x115   :  { %v699_v7 = vpop.f32.mrf.mxu0 }
 0x116   :  { %v740_v9 = vpop.f32.mrf.mxu1 }
 0x118   :  { %v817_v10 = vpop.f32.mrf.mxu1 }
 0x11a   :  { %v819_v11 = vpop.f32.mrf.mxu1 }
 0x11c   :  { %v821_v12 = vpop.f32.mrf.mxu1 }
 0x11e   :  { %v822_v13 = vpop.f32.mrf.mxu1 }
 0x14f   :  { %v776_v24 = vpop.f32.mrf.mxu0 }
 0x150   :  { %v777_v26 = vadd.f32 %v776_v24, %v736_v23 }
 0x151   :  { %v778_v27 = vpop.f32.mrf.mxu0 }
 0x152   :  { %v818_v28 = vadd.f32 %v817_v10, %v777_v26  ;;  %v779_v29 = vadd.f32 %v778_v27, %v738_v25 }
 0x153   :  { %v780_v30 = vpop.f32.mrf.mxu0 }
 0x154   :  { %v820_v31 = vadd.f32 %v819_v11, %v779_v29  ;;  %v824_v32 = vmax.f32 %v818_v28, 0.0 }
 0x155   :  { %v781_v33 = vpop.f32.mrf.mxu0 }
 0x156   :  { %v825_v34 = vmax.f32 %v820_v31, 0.0  ;;  %v826_v37 = vpack.c.bf16 %v824_v32, %v824_v32 }
 0x158   :  { %v827_v35 = vpack.c.bf16 %v825_v34, %v825_v34 }
 0x15a   :  { %995 = vmatprep.mubr.bf16.mxu1 %v827_v35 }
 0x15b   :  { %996 = vmatmul.mubr.bf16.vlgmr.msra.gmra.mxu1 %v826_v37 }
 0x15c   :  { %1266 = vmatpush3.bf16.msra.mxu1 %v1447_v36  ;;  %1273 = vmatprep.mubr.msk.bf16.mxu1 %vm1504_vm1, %v1503_v1 }
 0x15d   :  { %1267 = vmatprep.subr.bf16.mxu1 %v1503_v1 }
 0x160   :  { %1268 = vmatpush3.bf16.msra.mxu1 %v1448_v38 }
 0x161   :  { %1269 = vmatprep.subr.bf16.mxu1 %v1503_v1 }
 0x164   :  { %1270 = vmatpush3.bf16.msra.mxu1 %v1449_v39 }
 0x165   :  { %1271 = vmatprep.subr.bf16.mxu1 %v1503_v1 }
 0x168   :  { %1272 = vmatpush3.bf16.msra.mxu1 %v1450_v40 }
 0x21b   :  { %v1254_v41 = vpop.f32.mrf.mxu1 }
 0x21d   :  { %v1255_v43 = vpop.f32.mrf.mxu1 }
 0x21e   :  { %v1256_v44 = vadd.f32 %v1255_v43, %v1254_v41 }
 0x21f   :  { %v1257_v45 = vpop.f32.mrf.mxu1 }
 0x220   :  { %v998_v46 = vadd.f32 %v1256_v44, %v1215_v42 }
 0x221   :  { %v1258_v47 = vpop.f32.mrf.mxu1 }
 0x222   :  { %v1003_v48 = vmax.f32 %v998_v46, 0.0 }
 0x224   :  { %v1004_v49 = vpack.c.bf16 %v1003_v48, %v1003_v48 }
 0x226   :  { %1274 = vmatmul.mubr.msk.bf16.vlgmr.msra.gmra.mxu1 %vm1044_vm2, %v1004_v49 }
 0x2e6   :  { %v1082_v51 = vpop.f32.mrf.mxu1 }
 0x2e7   :  { %v1083_v52 = vadd.f32 %v1232_v50, %v1082_v51 }
 0x2e8   :  { %v1275_v53 = vpop.f32.mrf.mxu1 }
 0x2e9   :  { %1088 = vmax.xlane.f32.xlu0 %v1083_v52 }
 0x2ea   :  { %v1085_v54 = vpop.f32.mrf.mxu1 }
 0x2ec   :  { %v1276_v55 = vpop.f32.mrf.mxu1 }
 0x372   :  { %v1089_v56 = vpop.xlane.xlu0 %1088 }
 0x373   :  { %v1090_v57 = vsub.f32 %v1083_v52, %v1089_v56 }
 0x375   :  { %v1091_v58 = vmul.f32 1.442695, %v1090_v57 }
 0x377   :  { %1451 = vpow2.f32 %v1091_v58 }
 0x384   :  { %v1452_v59 = vpop.eup %1451 }
 0x385   :  { %1093 = vadd.xlane.f32.xlu0 %v1452_v59 }
 0x40e   :  { %v1094_v60 = vpop.xlane.xlu0 %1093 }
 0x40f   :  { %1453 = vlog2.f32 %v1094_v60 }
 0x41c   :  { %v1454_v61 = vpop.eup %1453 }
 0x41d   :  { %v1096_v62 = vmul.f32 0.6931472, %v1454_v61 }
 0x41f   :  { %v1097_v63 = vadd.f32 %v1096_v62, %v1089_v56 }
 0x421   :  { %v1098_v0 = vsub.f32 %v1083_v52, %v1097_v63 }
 0x423   :  { %1100 = vst.msk [vmem:[#allocation5] sm:$0xff] %vm1099_vm3, %v1098_v0 }
 0x424   :  { %1486 = shalt.err (!%p1483_p9)
}
 0x425   :  { %1110 = dma.vmem_to_hbm [thread:$0]  %s1108_s5, 128, %s1650_s7, [#allocation4]  }
 0x426   :  { %1497 = dma.done.wait [#allocation4], 128  }
 0x427   :  { %1498 = vsyncadd [#allocation4], 4294967168 }
 0x428   :  { %1114 = vsyncpa [#allocation3], 1 }
 0x429   :  { %1115 = vsyncpa [#allocation4], 1 }

</bundles_post_ra>
